<compile_context>
chip_gen: v7x
topology: tpu7x:2x2x1
jax: 0.10.0
libtpu: 0.0.40
codegen_flags: <defaults>
</compile_context>

<pallas_src>
import jax
import jax.numpy as jnp
from jax.experimental import pallas as pl
from jax.experimental.pallas import tpu as pltpu

# ---------------------------------------------------------------------------
# Model config (matches the PyTorch defaults)
# ---------------------------------------------------------------------------
IN_FEATURES = 32
OUT_FEATURES = 8
HIDDEN_SIZES = [124, 124, 64, 32, 16]   # default hidden_layer_size
PAD = 128                               # every feature dim padded to one lane tile
MAX_BATCH_TILE = 512                    # rows per grid step at large batch


def _round_up(n, m):
    return ((n + m - 1) // m) * m


def _tiling(batch):
    """Pick (padded_batch, batch_tile). Small batch -> one grid step."""
    if batch <= MAX_BATCH_TILE:
        tb = _round_up(max(batch, 1), 8)
        return tb, tb
    tb = MAX_BATCH_TILE
    return _round_up(batch, tb), tb


def _pad2d(a, rows, cols):
    return jnp.pad(a, ((0, rows - a.shape[0]), (0, cols - a.shape[1])))


# ---------------------------------------------------------------------------
# Kernel: whole MLP for one batch tile, entirely in VMEM.
# ---------------------------------------------------------------------------
def _mlp_kernel(x_ref, w_ref, b_ref, o_ref):
    n_layers = w_ref.shape[0]
    in_feat = x_ref.shape[-1]
    out_feat = o_ref.shape[-1]

    # Layer 0: use the true K = in_features (static slice of the padded weight).
    h = x_ref[...].astype(jnp.bfloat16)                         # (TB, in_feat)
    w0 = w_ref[0][:in_feat, :]                                  # (in_feat, PAD) bf16
    acc = jnp.dot(h, w0, preferred_element_type=jnp.float32) + b_ref[0]
    acc = jnp.maximum(acc, 0.0)                                 # ReLU (f32 VPU)

    # Hidden layers 1 .. n-2. Padded lanes stay exactly zero through Linear+ReLU.
    for l in range(1, n_layers - 1):
        acc = jnp.dot(acc.astype(jnp.bfloat16), w_ref[l],
                      preferred_element_type=jnp.float32) + b_ref[l]
        acc = jnp.maximum(acc, 0.0)

    # Output layer (no activation); store only the real output columns.
    out = jnp.dot(acc.astype(jnp.bfloat16), w_ref[n_layers - 1],
                  preferred_element_type=jnp.float32) + b_ref[n_layers - 1]
    o_ref[...] = out[:, :out_feat].astype(o_ref.dtype)


# ---------------------------------------------------------------------------
# Wrapper
# ---------------------------------------------------------------------------
@jax.jit
def fully_connected_forward(x, params):
    """x: [batch, in_features] float32. params: list of (W[in,out], b[out])."""
    batch, in_feat = x.shape
    n_layers = len(params)
    out_features = params[-1][0].shape[1]
    assert in_feat <= PAD and out_features <= PAD
    for (w, _) in params:
        assert w.shape[0] <= PAD and w.shape[1] <= PAD

    batch_p, tb = _tiling(batch)
    x_p = x if batch_p == batch else jnp.pad(x, ((0, batch_p - batch), (0, 0)))

    # Stack/pad the per-layer weights (bf16, stored [in,out]) and biases (f32)
    # into two constant-index buffers that stay resident across the grid.
    w_stack = jnp.stack(
        [_pad2d(w, PAD, PAD).astype(jnp.bfloat16) for (w, _) in params])
    b_stack = jnp.stack(
        [_pad2d(b.reshape(1, -1), 1, PAD) for (_, b) in params])

    grid = (batch_p // tb,)
    cost = pl.CostEstimate(
        flops=2 * batch_p * PAD * PAD * n_layers,
        transcendentals=0,
        bytes_accessed=(batch_p * (in_feat + out_features) * 4
                        + w_stack.size * 2 + b_stack.size * 4),
    )

    out_p = pl.pallas_call(
        _mlp_kernel,
        out_shape=jax.ShapeDtypeStruct((batch_p, out_features), jnp.float32),
        grid_spec=pltpu.PrefetchScalarGridSpec(
            num_scalar_prefetch=0,
            grid=grid,
            in_specs=[
                pl.BlockSpec((tb, in_feat), lambda i: (i, 0)),
                pl.BlockSpec((n_layers, PAD, PAD), lambda i: (0, 0, 0)),
                pl.BlockSpec((n_layers, 1, PAD), lambda i: (0, 0, 0)),
            ],
            out_specs=pl.BlockSpec((tb, out_features), lambda i: (i, 0)),
        ),
        compiler_params=pltpu.CompilerParams(
            dimension_semantics=("parallel",)),
        cost_estimate=cost,
    )(x_p, w_stack, b_stack)

    return out_p[:batch]


# ---------------------------------------------------------------------------
# Params init + reference
# ---------------------------------------------------------------------------
def init_params(key, in_features=IN_FEATURES, out_features=OUT_FEATURES,
                hidden_sizes=HIDDEN_SIZES):
    """Mimics nn.Linear's U(-1/sqrt(fan_in), 1/sqrt(fan_in)).

    Weights stored as [in, out] (transposed vs torch) so the kernel does x @ W.
    """
    sizes = [in_features] + list(hidden_sizes) + [out_features]
    params = []
    for i in range(len(sizes) - 1):
        fan_in, fan_out = sizes[i], sizes[i + 1]
        key, kw, kb = jax.random.split(key, 3)
        bound = 1.0 / (fan_in ** 0.5)
        w = jax.random.uniform(kw, (fan_in, fan_out), jnp.float32, -bound, bound)
        b = jax.random.uniform(kb, (fan_out,), jnp.float32, -bound, bound)
        params.append((w, b))
    return params


def _reference_forward(x, params):
    """Matches kernel numerics: bf16 operands, f32 accumulation."""
    h = x
    for (w, b) in params[:-1]:
        y = jnp.dot(h.astype(jnp.bfloat16), w.astype(jnp.bfloat16),
                    preferred_element_type=jnp.float32) + b
        h = jnp.maximum(y, 0.0)
    w, b = params[-1]
    return jnp.dot(h.astype(jnp.bfloat16), w.astype(jnp.bfloat16),
                   preferred_element_type=jnp.float32) + b


if __name__ == "__main__":
    key = jax.random.PRNGKey(0)
    key, kx1, kx2 = jax.random.split(key, 3)
    params = init_params(key)

    # Small-batch / latency path: single grid step.
    x_small = jax.random.normal(kx1, (16, IN_FEATURES), jnp.float32)
    out_small = jax.block_until_ready(fully_connected_forward(x_small, params))
    ref_small = _reference_forward(x_small, params)
    assert out_small.shape == (16, OUT_FEATURES), out_small.shape
    assert jnp.allclose(out_small, ref_small, atol=1e-2, rtol=1e-2), \
        float(jnp.max(jnp.abs(out_small - ref_small)))

    # Larger batch: 512-row tiles, multi-step parallel grid (both v7x cores busy).
    x_big = jax.random.normal(kx2, (1024, IN_FEATURES), jnp.float32)
    out_big = jax.block_until_ready(fully_connected_forward(x_big, params))
    ref_big = _reference_forward(x_big, params)
    assert out_big.shape == (1024, OUT_FEATURES), out_big.shape
    assert jnp.allclose(out_big, ref_big, atol=1e-2, rtol=1e-2), \
        float(jnp.max(jnp.abs(out_big - ref_big)))

    print("KERNEL_OK")
</pallas_src>

<mosaic_0001>
module attributes {stable_mosaic.version = 11 : i64} {
  func.func @_mlp_kernel(%arg0: i32, %arg1: memref<16x32xf32, #tpu.memory_space<vmem>>, %arg2: memref<6x128x128xbf16, #tpu.memory_space<vmem>>, %arg3: memref<6x1x128xf32, #tpu.memory_space<vmem>>, %arg4: memref<16x8xf32, #tpu.memory_space<vmem>>) attributes {dimension_semantics = [#tpu.dimension_semantics<parallel>], iteration_bounds = array<i64: 1>, scalar_prefetch = 0 : i64, scratch_operands = 0 : i64, tpu.core_type = #tpu.core_type<tc>, window_params = [{transform_indices = @transform_0, window_bounds = array<i64: 16, 32>}, {pipeline_mode = #tpu.pipeline_mode<synchronous>, transform_indices = @transform_1, window_bounds = array<i64: 6, 128, 128>}, {pipeline_mode = #tpu.pipeline_mode<synchronous>, transform_indices = @transform_2, window_bounds = array<i64: 6, 1, 128>}, {transform_indices = @transform_3, window_bounds = array<i64: 16, 8>}]} {
    %c0 = arith.constant 0 : index
    %c0_0 = arith.constant 0 : index
    %0 = vector.load %arg1[%c0, %c0_0] : memref<16x32xf32, #tpu.memory_space<vmem>>, vector<16x32xf32>
    %1 = arith.truncf %0 : vector<16x32xf32> to vector<16x32xbf16>
    %c0_1 = arith.constant 0 : index
    %c0_2 = arith.constant 0 : index
    %c0_3 = arith.constant 0 : index
    %2 = vector.load %arg2[%c0_1, %c0_2, %c0_3] : memref<6x128x128xbf16, #tpu.memory_space<vmem>>, vector<1x128x128xbf16>
    %3 = vector.shape_cast %2 : vector<1x128x128xbf16> to vector<128x128xbf16>
    %4 = vector.extract_strided_slice %3 {offsets = [0, 0], sizes = [32, 128], strides = [1, 1]} : vector<128x128xbf16> to vector<32x128xbf16>
    %cst = arith.constant dense<0.000000e+00> : vector<16x128xf32>
    %5 = tpu.matmul %1, %4, %cst {dimension_numbers = #tpu.dot_dimension_numbers<[1], [0], [0], [1], [0, 0, 1, 1], [], []>} : vector<16x32xbf16>, vector<32x128xbf16>, vector<16x128xf32> -> vector<16x128xf32>
    %c0_4 = arith.constant 0 : index
    %c0_5 = arith.constant 0 : index
    %c0_6 = arith.constant 0 : index
    %6 = vector.load %arg3[%c0_4, %c0_5, %c0_6] : memref<6x1x128xf32, #tpu.memory_space<vmem>>, vector<1x1x128xf32>
    %7 = vector.shape_cast %6 : vector<1x1x128xf32> to vector<1x128xf32>
    %8 = vector.broadcast %7 : vector<1x128xf32> to vector<16x128xf32>
    %9 = arith.addf %5, %8 : vector<16x128xf32>
    %cst_7 = arith.constant 0.000000e+00 : f32
    %10 = vector.broadcast %cst_7 : f32 to vector<16x128xf32>
    %11 = arith.maximumf %9, %10 : vector<16x128xf32>
    %12 = arith.truncf %11 : vector<16x128xf32> to vector<16x128xbf16>
    %c1 = arith.constant 1 : index
    %c0_8 = arith.constant 0 : index
    %c0_9 = arith.constant 0 : index
    %13 = vector.load %arg2[%c1, %c0_8, %c0_9] : memref<6x128x128xbf16, #tpu.memory_space<vmem>>, vector<1x128x128xbf16>
    %14 = vector.shape_cast %13 : vector<1x128x128xbf16> to vector<128x128xbf16>
    %cst_10 = arith.constant dense<0.000000e+00> : vector<16x128xf32>
    %15 = tpu.matmul %12, %14, %cst_10 {dimension_numbers = #tpu.dot_dimension_numbers<[1], [0], [0], [1], [0, 0, 1, 1], [], []>} : vector<16x128xbf16>, vector<128x128xbf16>, vector<16x128xf32> -> vector<16x128xf32>
    %c1_11 = arith.constant 1 : index
    %c0_12 = arith.constant 0 : index
    %c0_13 = arith.constant 0 : index
    %16 = vector.load %arg3[%c1_11, %c0_12, %c0_13] : memref<6x1x128xf32, #tpu.memory_space<vmem>>, vector<1x1x128xf32>
    %17 = vector.shape_cast %16 : vector<1x1x128xf32> to vector<1x128xf32>
    %18 = vector.broadcast %17 : vector<1x128xf32> to vector<16x128xf32>
    %19 = arith.addf %15, %18 : vector<16x128xf32>
    %cst_14 = arith.constant 0.000000e+00 : f32
    %20 = vector.broadcast %cst_14 : f32 to vector<16x128xf32>
    %21 = arith.maximumf %19, %20 : vector<16x128xf32>
    %22 = arith.truncf %21 : vector<16x128xf32> to vector<16x128xbf16>
    %c2 = arith.constant 2 : index
    %c0_15 = arith.constant 0 : index
    %c0_16 = arith.constant 0 : index
    %23 = vector.load %arg2[%c2, %c0_15, %c0_16] : memref<6x128x128xbf16, #tpu.memory_space<vmem>>, vector<1x128x128xbf16>
    %24 = vector.shape_cast %23 : vector<1x128x128xbf16> to vector<128x128xbf16>
    %cst_17 = arith.constant dense<0.000000e+00> : vector<16x128xf32>
    %25 = tpu.matmul %22, %24, %cst_17 {dimension_numbers = #tpu.dot_dimension_numbers<[1], [0], [0], [1], [0, 0, 1, 1], [], []>} : vector<16x128xbf16>, vector<128x128xbf16>, vector<16x128xf32> -> vector<16x128xf32>
    %c2_18 = arith.constant 2 : index
    %c0_19 = arith.constant 0 : index
    %c0_20 = arith.constant 0 : index
    %26 = vector.load %arg3[%c2_18, %c0_19, %c0_20] : memref<6x1x128xf32, #tpu.memory_space<vmem>>, vector<1x1x128xf32>
    %27 = vector.shape_cast %26 : vector<1x1x128xf32> to vector<1x128xf32>
    %28 = vector.broadcast %27 : vector<1x128xf32> to vector<16x128xf32>
    %29 = arith.addf %25, %28 : vector<16x128xf32>
    %cst_21 = arith.constant 0.000000e+00 : f32
    %30 = vector.broadcast %cst_21 : f32 to vector<16x128xf32>
    %31 = arith.maximumf %29, %30 : vector<16x128xf32>
    %32 = arith.truncf %31 : vector<16x128xf32> to vector<16x128xbf16>
    %c3 = arith.constant 3 : index
    %c0_22 = arith.constant 0 : index
    %c0_23 = arith.constant 0 : index
    %33 = vector.load %arg2[%c3, %c0_22, %c0_23] : memref<6x128x128xbf16, #tpu.memory_space<vmem>>, vector<1x128x128xbf16>
    %34 = vector.shape_cast %33 : vector<1x128x128xbf16> to vector<128x128xbf16>
    %cst_24 = arith.constant dense<0.000000e+00> : vector<16x128xf32>
    %35 = tpu.matmul %32, %34, %cst_24 {dimension_numbers = #tpu.dot_dimension_numbers<[1], [0], [0], [1], [0, 0, 1, 1], [], []>} : vector<16x128xbf16>, vector<128x128xbf16>, vector<16x128xf32> -> vector<16x128xf32>
    %c3_25 = arith.constant 3 : index
    %c0_26 = arith.constant 0 : index
    %c0_27 = arith.constant 0 : index
    %36 = vector.load %arg3[%c3_25, %c0_26, %c0_27] : memref<6x1x128xf32, #tpu.memory_space<vmem>>, vector<1x1x128xf32>
    %37 = vector.shape_cast %36 : vector<1x1x128xf32> to vector<1x128xf32>
    %38 = vector.broadcast %37 : vector<1x128xf32> to vector<16x128xf32>
    %39 = arith.addf %35, %38 : vector<16x128xf32>
    %cst_28 = arith.constant 0.000000e+00 : f32
    %40 = vector.broadcast %cst_28 : f32 to vector<16x128xf32>
    %41 = arith.maximumf %39, %40 : vector<16x128xf32>
    %42 = arith.truncf %41 : vector<16x128xf32> to vector<16x128xbf16>
    %c4 = arith.constant 4 : index
    %c0_29 = arith.constant 0 : index
    %c0_30 = arith.constant 0 : index
    %43 = vector.load %arg2[%c4, %c0_29, %c0_30] : memref<6x128x128xbf16, #tpu.memory_space<vmem>>, vector<1x128x128xbf16>
    %44 = vector.shape_cast %43 : vector<1x128x128xbf16> to vector<128x128xbf16>
    %cst_31 = arith.constant dense<0.000000e+00> : vector<16x128xf32>
    %45 = tpu.matmul %42, %44, %cst_31 {dimension_numbers = #tpu.dot_dimension_numbers<[1], [0], [0], [1], [0, 0, 1, 1], [], []>} : vector<16x128xbf16>, vector<128x128xbf16>, vector<16x128xf32> -> vector<16x128xf32>
    %c4_32 = arith.constant 4 : index
    %c0_33 = arith.constant 0 : index
    %c0_34 = arith.constant 0 : index
    %46 = vector.load %arg3[%c4_32, %c0_33, %c0_34] : memref<6x1x128xf32, #tpu.memory_space<vmem>>, vector<1x1x128xf32>
    %47 = vector.shape_cast %46 : vector<1x1x128xf32> to vector<1x128xf32>
    %48 = vector.broadcast %47 : vector<1x128xf32> to vector<16x128xf32>
    %49 = arith.addf %45, %48 : vector<16x128xf32>
    %cst_35 = arith.constant 0.000000e+00 : f32
    %50 = vector.broadcast %cst_35 : f32 to vector<16x128xf32>
    %51 = arith.maximumf %49, %50 : vector<16x128xf32>
    %52 = arith.truncf %51 : vector<16x128xf32> to vector<16x128xbf16>
    %c5 = arith.constant 5 : index
    %c0_36 = arith.constant 0 : index
    %c0_37 = arith.constant 0 : index
    %53 = vector.load %arg2[%c5, %c0_36, %c0_37] : memref<6x128x128xbf16, #tpu.memory_space<vmem>>, vector<1x128x128xbf16>
    %54 = vector.shape_cast %53 : vector<1x128x128xbf16> to vector<128x128xbf16>
    %cst_38 = arith.constant dense<0.000000e+00> : vector<16x128xf32>
    %55 = tpu.matmul %52, %54, %cst_38 {dimension_numbers = #tpu.dot_dimension_numbers<[1], [0], [0], [1], [0, 0, 1, 1], [], []>} : vector<16x128xbf16>, vector<128x128xbf16>, vector<16x128xf32> -> vector<16x128xf32>
    %c5_39 = arith.constant 5 : index
    %c0_40 = arith.constant 0 : index
    %c0_41 = arith.constant 0 : index
    %56 = vector.load %arg3[%c5_39, %c0_40, %c0_41] : memref<6x1x128xf32, #tpu.memory_space<vmem>>, vector<1x1x128xf32>
    %57 = vector.shape_cast %56 : vector<1x1x128xf32> to vector<1x128xf32>
    %58 = vector.broadcast %57 : vector<1x128xf32> to vector<16x128xf32>
    %59 = arith.addf %55, %58 : vector<16x128xf32>
    %60 = vector.extract_strided_slice %59 {offsets = [0, 0], sizes = [16, 8], strides = [1, 1]} : vector<16x128xf32> to vector<16x8xf32>
    %c0_42 = arith.constant 0 : index
    %c0_43 = arith.constant 0 : index
    %61 = vector.load %arg4[%c0_42, %c0_43] : memref<16x8xf32, #tpu.memory_space<vmem>>, vector<16x8xf32>
    tpu.vector_store %arg4[%c0_42, %c0_43], %60 {strides = array<i32>} : memref<16x8xf32, #tpu.memory_space<vmem>>, vector<16x8xf32>,
    return
  }
  func.func @transform_0(%arg0: i32) -> (i32, i32) {
    %c0_i32 = arith.constant 0 : i32
    %c0_i32_0 = arith.constant 0 : i32
    return %arg0, %c0_i32 : i32, i32
  }
  func.func @transform_1(%arg0: i32) -> (i32, i32, i32) {
    %c0_i32 = arith.constant 0 : i32
    %c0_i32_0 = arith.constant 0 : i32
    %c0_i32_1 = arith.constant 0 : i32
    %c0_i32_2 = arith.constant 0 : i32
    return %c0_i32, %c0_i32_0, %c0_i32_1 : i32, i32, i32
  }
  func.func @transform_2(%arg0: i32) -> (i32, i32, i32) {
    %c0_i32 = arith.constant 0 : i32
    %c0_i32_0 = arith.constant 0 : i32
    %c0_i32_1 = arith.constant 0 : i32
    %c0_i32_2 = arith.constant 0 : i32
    return %c0_i32, %c0_i32_0, %c0_i32_1 : i32, i32, i32
  }
  func.func @transform_3(%arg0: i32) -> (i32, i32) {
    %c0_i32 = arith.constant 0 : i32
    %c0_i32_0 = arith.constant 0 : i32
    return %arg0, %c0_i32 : i32, i32
  }
}

</mosaic_0001>

<bundles_post_ra>
// kernel: fully_connected_forward.1
= control target key start
LH: loop header
LB: loop body
LE: loop exit
PB: predicated region body
PF: predicated region fallthrough
CT: control target
= control target key end

     0   :  { %v1012_v0 = vmov 0.0   ;;  %vm1013_vm0 = vmmov 0   ;;  %vm41_vm1 = vcmask 261120   ;;  %vm671_vm2 = vcmask 64512   ;;  %s1244_s1 = inlined_call_operand.vmem [shape: bf16[6,128,128], index: 1, kind: input, shape index: {}]   ;;  %s1245_s0 = inlined_call_operand.vmem [shape: f32[16,32], index: 0, kind: input, shape index: {}]   ;;  %s1246_s2 = inlined_call_operand.vmem [shape: f32[6,1,128], index: 2, kind: input, shape index: {}]   ;;  %s1247_s3 = inlined_call_operand.vmem [shape: f32[16,8], index: 3, kind: output, shape index: {}]  }
   0x1   :  { %860 = vmatprep.subr.bf16.mxu0 %v1012_v0  ;;  %v970_v1 = vld [vmem:[%s1244_s1] sm:$0xff]   ;;  %864 = vmatprep.mubr.msk.bf16.mxu0 %vm1013_vm0, %v1012_v0  ;;  %v971_v2 = vld [vmem:[%s1244_s1 + $0x8] sm:$0xff]   ;;  %v974_v8 = vld [vmem:[%s1244_s1 + $0x50] sm:$0xff]  }
   0x2   :  { %868 = vmatprep.subr.bf16.mxu1 %v1012_v0  ;;  %884 = vmatprep.mubr.msk.bf16.mxu1 %vm1013_vm0, %v1012_v0  ;;  %v15_v3 = vld [vmem:[%s1245_s0] sm:$0xff]  ;;  %v16_v4 = vld [vmem:[%s1245_s0 + $0x8] sm:$0xff]  ;;  %v975_v9 = vld [vmem:[%s1244_s1 + $0x58] sm:$0xff]  }
   0x3   :  { %861 = vmatpush3.bf16.msra.mxu0 %v970_v1  ;;  %v972_v5 = vld [vmem:[%s1244_s1 + $0x40] sm:$0xff]   ;;  %v17_v6 = vpack.c.bf16 %v16_v4, %v15_v3  ;;  %v973_v7 = vld [vmem:[%s1244_s1 + $0x48] sm:$0xff]   ;;  %v978_v12 = vld [vmem:[%s1244_s1 + $0x70] sm:$0xff]  }
   0x4   :  { %862 = vmatprep.subr.bf16.mxu0 %v1012_v0  ;;  %869 = vmatpush3.bf16.msra.mxu1 %v972_v5  ;;  %v976_v10 = vld [vmem:[%s1244_s1 + $0x60] sm:$0xff]   ;;  %v977_v11 = vld [vmem:[%s1244_s1 + $0x68] sm:$0xff]   ;;  %v979_v13 = vld [vmem:[%s1244_s1 + $0x78] sm:$0xff]  }
   0x5   :  { %870 = vmatprep.subr.bf16.mxu1 %v1012_v0  ;;  %v980_v14 = vld [vmem:[%s1244_s1 + $0x80] sm:$0xff]   ;;  %v981_v15 = vld [vmem:[%s1244_s1 + $0x88] sm:$0xff]   ;;  %v982_v16 = vld [vmem:[%s1244_s1 + $0x90] sm:$0xff]  }
   0x6   :  { %v983_v17 = vld [vmem:[%s1244_s1 + $0x98] sm:$0xff]   ;;  %v984_v18 = vld [vmem:[%s1244_s1 + $0xa0] sm:$0xff]   ;;  %v985_v19 = vld [vmem:[%s1244_s1 + $0xa8] sm:$0xff]  }
   0x7   :  { %863 = vmatpush3.bf16.msra.mxu0 %v971_v2  ;;  %v678_v20 = vld [vmem:[%s1246_s2] ss:$0 sm:$0xff]  ;;  %v986_v30 = vld [vmem:[%s1244_s1 + $0xb0] sm:$0xff]   ;;  %v987_v31 = vld [vmem:[%s1244_s1 + $0xb8] sm:$0xff]  }
   0x8   :  { %888 = vmatprep.subr.bf16.mxu0 %v1012_v0  ;;  %871 = vmatpush3.bf16.msra.mxu1 %v973_v7  ;;  %v988_v32 = vld [vmem:[%s1244_s1 + $0xc0] sm:$0xff]   ;;  %v989_v33 = vld [vmem:[%s1244_s1 + $0xc8] sm:$0xff]   ;;  %v990_v34 = vld [vmem:[%s1244_s1 + $0xd0] sm:$0xff]  }
   0x9   :  { %872 = vmatprep.subr.bf16.mxu1 %v1012_v0  ;;  %v991_v35 = vld [vmem:[%s1244_s1 + $0xd8] sm:$0xff]   ;;  %v992_v36 = vld [vmem:[%s1244_s1 + $0xe0] sm:$0xff]   ;;  %v993_v37 = vld [vmem:[%s1244_s1 + $0xe8] sm:$0xff]  }
   0xa   :  { %865 = vmatmul.mubr.msk.bf16.vlgmr.msra.gmra.mrb[0].mxu0 %vm41_vm1, %v17_v6  ;;  %v699_v38 = vld [vmem:[%s1246_s2 + $0x1] ss:$0 sm:$0xff]  ;;  %v994_v48 = vld [vmem:[%s1244_s1 + $0xf0] sm:$0xff]   ;;  %v995_v49 = vld [vmem:[%s1244_s1 + $0xf8] sm:$0xff]  }
   0xb   :  { %904 = vmatprep.mubr.msk.bf16.mxu0 %vm1013_vm0, %v1012_v0  ;;  %889 = vmatpush3.bf16.msra.mxu0 %v980_v14  ;;  %v996_v50 = vld [vmem:[%s1244_s1 + $0x100] sm:$0xff]   ;;  %v997_v51 = vld [vmem:[%s1244_s1 + $0x108] sm:$0xff]   ;;  %v998_v52 = vld [vmem:[%s1244_s1 + $0x110] sm:$0xff]  }
   0xc   :  { %873 = vmatpush3.bf16.msra.mxu1 %v974_v8  ;;  %890 = vmatprep.subr.bf16.mxu0 %v1012_v0  ;;  %v999_v53 = vld [vmem:[%s1244_s1 + $0x118] sm:$0xff]   ;;  %v1000_v54 = vld [vmem:[%s1244_s1 + $0x120] sm:$0xff]   ;;  %v1001_v55 = vld [vmem:[%s1244_s1 + $0x128] sm:$0xff]  }
   0xd   :  { %874 = vmatprep.subr.bf16.mxu1 %v1012_v0  ;;  %v725_v56 = vld [vmem:[%s1246_s2 + $0x2] ss:$0 sm:$0xff]  ;;  %v1002_v3 = vld [vmem:[%s1244_s1 + $0x130] sm:$0xff]   ;;  %v1003_v4 = vld [vmem:[%s1244_s1 + $0x138] sm:$0xff]  }
   0xe   :  { %v1004_v5 = vld [vmem:[%s1244_s1 + $0x140] sm:$0xff]   ;;  %v1005_v6 = vld [vmem:[%s1244_s1 + $0x148] sm:$0xff]   ;;  %v1006_v7 = vld [vmem:[%s1244_s1 + $0x150] sm:$0xff]  }
   0xf   :  { %891 = vmatpush3.bf16.msra.mxu0 %v981_v15  ;;  %v1007_v8 = vld [vmem:[%s1244_s1 + $0x158] sm:$0xff]  }
  0x10   :  { %875 = vmatpush3.bf16.msra.mxu1 %v975_v9  ;;  %892 = vmatprep.subr.bf16.mxu0 %v1012_v0  ;;  %v1008_v9 = vld [vmem:[%s1244_s1 + $0x160] sm:$0xff]  }
  0x11   :  { %876 = vmatprep.subr.bf16.mxu1 %v1012_v0 }
  0x13   :  { %893 = vmatpush3.bf16.msra.mxu0 %v982_v16 }
  0x14   :  { %877 = vmatpush3.bf16.msra.mxu1 %v976_v10  ;;  %894 = vmatprep.subr.bf16.mxu0 %v1012_v0  ;;  %v1009_v10 = vld [vmem:[%s1244_s1 + $0x168] sm:$0xff]  }
  0x15   :  { %878 = vmatprep.subr.bf16.mxu1 %v1012_v0 }
  0x17   :  { %895 = vmatpush3.bf16.msra.mxu0 %v983_v17 }
  0x18   :  { %879 = vmatpush3.bf16.msra.mxu1 %v977_v11  ;;  %896 = vmatprep.subr.bf16.mxu0 %v1012_v0  ;;  %v751_v11 = vld [vmem:[%s1246_s2 + $0x3] ss:$0 sm:$0xff] }
  0x19   :  { %880 = vmatprep.subr.bf16.mxu1 %v1012_v0 }
  0x1b   :  { %897 = vmatpush3.bf16.msra.mxu0 %v984_v18 }
  0x1c   :  { %881 = vmatpush3.bf16.msra.mxu1 %v978_v12  ;;  %898 = vmatprep.subr.bf16.mxu0 %v1012_v0 }
  0x1d   :  { %882 = vmatprep.subr.bf16.mxu1 %v1012_v0 }
  0x1f   :  { %899 = vmatpush3.bf16.msra.mxu0 %v985_v19 }
  0x20   :  { %883 = vmatpush3.bf16.msra.mxu1 %v979_v13  ;;  %900 = vmatprep.subr.bf16.mxu0 %v1012_v0 }
  0x21   :  { %908 = vmatprep.subr.bf16.mxu1 %v1012_v0 }
  0x23   :  { %901 = vmatpush3.bf16.msra.mxu0 %v986_v30 }
  0x24   :  { %902 = vmatprep.subr.bf16.mxu0 %v1012_v0 }
  0x27   :  { %903 = vmatpush3.bf16.msra.mxu0 %v987_v31 }
  0x28   :  { %928 = vmatprep.subr.bf16.mxu0 %v1012_v0 }
  0xdd   :  { %v79_v21 = vpop.f32.mrb[0].mxu0 }
  0xde   :  { %v80_v22 = vadd.f32 %v678_v20, %v79_v21  ;;  %v866_v23 = vpop.f32.mrb[1].mxu0  ;;  %v1010_v21 = vld [vmem:[%s1244_s1 + $0x170] sm:$0xff]  }
  0xdf   :  { %v82_v24 = vpop.f32.mrb[2].mxu0  ;;  %v777_v23 = vld [vmem:[%s1246_s2 + $0x4] ss:$0 sm:$0xff] }
  0xe0   :  { %v83_v25 = vadd.f32 %v678_v20, %v82_v24  ;;  %v867_v26 = vpop.f32.mrb[3].mxu0  ;;  %v86_v27 = vmax.f32 %v80_v22, 0.0  ;;  %v1011_v22 = vld [vmem:[%s1244_s1 + $0x178] sm:$0xff]  }
  0xe2   :  { %v87_v28 = vmax.f32 %v83_v25, 0.0 }
  0xe4   :  { %v88_v29 = vpack.c.bf16 %v87_v28, %v86_v27 }
  0xe6   :  { %885 = vmatmul.mubr.bf16.vlgmr.msra.gmra.mrb[0].mxu1 %v88_v29 }
  0xe7   :  { %924 = vmatprep.mubr.msk.bf16.mxu1 %vm1013_vm0, %v1012_v0  ;;  %909 = vmatpush3.bf16.msra.mxu1 %v988_v32 }
  0xe8   :  { %910 = vmatprep.subr.bf16.mxu1 %v1012_v0 }
  0xeb   :  { %911 = vmatpush3.bf16.msra.mxu1 %v989_v33 }
  0xec   :  { %912 = vmatprep.subr.bf16.mxu1 %v1012_v0 }
  0xef   :  { %913 = vmatpush3.bf16.msra.mxu1 %v990_v34 }
  0xf0   :  { %914 = vmatprep.subr.bf16.mxu1 %v1012_v0 }
  0xf3   :  { %915 = vmatpush3.bf16.msra.mxu1 %v991_v35 }
  0xf4   :  { %916 = vmatprep.subr.bf16.mxu1 %v1012_v0 }
  0xf7   :  { %917 = vmatpush3.bf16.msra.mxu1 %v992_v36 }
  0xf8   :  { %918 = vmatprep.subr.bf16.mxu1 %v1012_v0 }
  0xfb   :  { %919 = vmatpush3.bf16.msra.mxu1 %v993_v37 }
  0xfc   :  { %920 = vmatprep.subr.bf16.mxu1 %v1012_v0 }
  0xff   :  { %921 = vmatpush3.bf16.msra.mxu1 %v994_v48 }
 0x100   :  { %922 = vmatprep.subr.bf16.mxu1 %v1012_v0 }
 0x103   :  { %923 = vmatpush3.bf16.msra.mxu1 %v995_v49 }
 0x104   :  { %948 = vmatprep.subr.bf16.mxu1 %v1012_v0 }
 0x1b9   :  { %v196_v39 = vpop.f32.mrb[0].mxu1 }
 0x1ba   :  { %v197_v40 = vadd.f32 %v699_v38, %v196_v39  ;;  %v886_v41 = vpop.f32.mrb[1].mxu1 }
 0x1bb   :  { %v199_v42 = vpop.f32.mrb[2].mxu1 }
 0x1bc   :  { %v200_v43 = vadd.f32 %v699_v38, %v199_v42  ;;  %v887_v44 = vpop.f32.mrb[3].mxu1  ;;  %v203_v45 = vmax.f32 %v197_v40, 0.0 }
 0x1be   :  { %v204_v46 = vmax.f32 %v200_v43, 0.0 }
 0x1c0   :  { %v205_v47 = vpack.c.bf16 %v204_v46, %v203_v45 }
 0x1c2   :  { %905 = vmatmul.mubr.bf16.vlgmr.msra.gmra.mrb[4].mxu0 %v205_v47 }
 0x1c3   :  { %944 = vmatprep.mubr.msk.bf16.mxu0 %vm1013_vm0, %v1012_v0  ;;  %929 = vmatpush3.bf16.msra.mxu0 %v996_v50 }
 0x1c4   :  { %930 = vmatprep.subr.bf16.mxu0 %v1012_v0 }
 0x1c7   :  { %931 = vmatpush3.bf16.msra.mxu0 %v997_v51 }
 0x1c8   :  { %932 = vmatprep.subr.bf16.mxu0 %v1012_v0 }
 0x1cb   :  { %933 = vmatpush3.bf16.msra.mxu0 %v998_v52 }
 0x1cc   :  { %934 = vmatprep.subr.bf16.mxu0 %v1012_v0 }
 0x1cf   :  { %935 = vmatpush3.bf16.msra.mxu0 %v999_v53 }
 0x1d0   :  { %936 = vmatprep.subr.bf16.mxu0 %v1012_v0 }
 0x1d3   :  { %937 = vmatpush3.bf16.msra.mxu0 %v1000_v54 }
 0x1d4   :  { %938 = vmatprep.subr.bf16.mxu0 %v1012_v0 }
 0x1d7   :  { %939 = vmatpush3.bf16.msra.mxu0 %v1001_v55 }
 0x1d8   :  { %940 = vmatprep.subr.bf16.mxu0 %v1012_v0 }
 0x1db   :  { %941 = vmatpush3.bf16.msra.mxu0 %v1002_v3 }
 0x1dc   :  { %942 = vmatprep.subr.bf16.mxu0 %v1012_v0 }
 0x1df   :  { %943 = vmatpush3.bf16.msra.mxu0 %v1003_v4 }
 0x295   :  { %v313_v57 = vpop.f32.mrb[4].mxu0 }
 0x296   :  { %v314_v58 = vadd.f32 %v725_v56, %v313_v57  ;;  %v906_v59 = vpop.f32.mrb[5].mxu0 }
 0x297   :  { %v316_v60 = vpop.f32.mrb[6].mxu0 }
 0x298   :  { %v317_v61 = vadd.f32 %v725_v56, %v316_v60  ;;  %v907_v62 = vpop.f32.mrb[7].mxu0  ;;  %v320_v63 = vmax.f32 %v314_v58, 0.0 }
 0x29a   :  { %v321_v1 = vmax.f32 %v317_v61, 0.0 }
 0x29c   :  { %v322_v2 = vpack.c.bf16 %v321_v1, %v320_v63 }
 0x29e   :  { %925 = vmatmul.mubr.bf16.vlgmr.msra.gmra.mrb[4].mxu1 %v322_v2 }
 0x29f   :  { %964 = vmatprep.mubr.msk.bf16.mxu1 %vm1013_vm0, %v1012_v0  ;;  %949 = vmatpush3.bf16.msra.mxu1 %v1004_v5 }
 0x2a0   :  { %950 = vmatprep.subr.bf16.mxu1 %v1012_v0 }
 0x2a3   :  { %951 = vmatpush3.bf16.msra.mxu1 %v1005_v6 }
 0x2a4   :  { %952 = vmatprep.subr.bf16.mxu1 %v1012_v0 }
 0x2a7   :  { %953 = vmatpush3.bf16.msra.mxu1 %v1006_v7 }
 0x2a8   :  { %954 = vmatprep.subr.bf16.mxu1 %v1012_v0 }
 0x2ab   :  { %955 = vmatpush3.bf16.msra.mxu1 %v1007_v8 }
 0x2ac   :  { %956 = vmatprep.subr.bf16.mxu1 %v1012_v0 }
 0x2af   :  { %957 = vmatpush3.bf16.msra.mxu1 %v1008_v9 }
 0x2b0   :  { %958 = vmatprep.subr.bf16.mxu1 %v1012_v0 }
 0x2b3   :  { %959 = vmatpush3.bf16.msra.mxu1 %v1009_v10 }
 0x2b4   :  { %960 = vmatprep.subr.bf16.mxu1 %v1012_v0 }
 0x2b7   :  { %961 = vmatpush3.bf16.msra.mxu1 %v1010_v21 }
 0x2b8   :  { %962 = vmatprep.subr.bf16.mxu1 %v1012_v0  ;;  %v803_v0 = vld [vmem:[%s1246_s2 + $0x5] ss:$0 sm:$0xff] }
 0x2bb   :  { %963 = vmatpush3.bf16.msra.mxu1 %v1011_v22 }
 0x371   :  { %v430_v12 = vpop.f32.mrb[4].mxu1 }
 0x372   :  { %v431_v13 = vadd.f32 %v751_v11, %v430_v12  ;;  %v926_v14 = vpop.f32.mrb[5].mxu1 }
 0x373   :  { %v433_v15 = vpop.f32.mrb[6].mxu1 }
 0x374   :  { %v434_v16 = vadd.f32 %v751_v11, %v433_v15  ;;  %v927_v17 = vpop.f32.mrb[7].mxu1  ;;  %v437_v18 = vmax.f32 %v431_v13, 0.0 }
 0x376   :  { %v438_v19 = vmax.f32 %v434_v16, 0.0 }
 0x378   :  { %v439_v20 = vpack.c.bf16 %v438_v19, %v437_v18 }
 0x37a   :  { %945 = vmatmul.mubr.bf16.vlgmr.msra.gmra.mrb[8].mxu0 %v439_v20 }
 0x44d   :  { %v547_v24 = vpop.f32.mrb[8].mxu0 }
 0x44e   :  { %v548_v25 = vadd.f32 %v777_v23, %v547_v24  ;;  %v946_v26 = vpop.f32.mrb[9].mxu0 }
 0x44f   :  { %v550_v27 = vpop.f32.mrb[10].mxu0 }
 0x450   :  { %v551_v28 = vadd.f32 %v777_v23, %v550_v27  ;;  %v947_v29 = vpop.f32.mrb[11].mxu0  ;;  %v554_v30 = vmax.f32 %v548_v25, 0.0 }
 0x452   :  { %v555_v31 = vmax.f32 %v551_v28, 0.0 }
 0x454   :  { %v556_v32 = vpack.c.bf16 %v555_v31, %v554_v30 }
 0x456   :  { %965 = vmatmul.mubr.bf16.vlgmr.msra.gmra.mrb[8].mxu1 %v556_v32 }
 0x529   :  { %v664_v33 = vpop.f32.mrb[8].mxu1 }
 0x52a   :  { %v665_v34 = vadd.f32 %v803_v0, %v664_v33  ;;  %v966_v35 = vpop.f32.mrb[9].mxu1 }
 0x52b   :  { %v667_v36 = vpop.f32.mrb[10].mxu1 }
 0x52c   :  { %672 = vst.msk [vmem:[%s1247_s3] sm:$0xff] %vm671_vm2, %v665_v34  ;;  %v668_v37 = vadd.f32 %v803_v0, %v667_v36  ;;  %v967_v38 = vpop.f32.mrb[11].mxu1 }
 0x52e   :  { %673 = vst.msk [vmem:[%s1247_s3 + $0x8] sm:$0xff] %vm671_vm2, %v668_v37 }

</bundles_post_ra>
